<compile_context>
chip_gen: v6e
topology: v6e:2x2x1
jax: 0.10.0
libtpu: 0.0.40
codegen_flags: <defaults>
</compile_context>

<pallas_src>
import functools

import jax
import jax.numpy as jnp
from jax.experimental import pallas as pl
from jax.experimental.pallas import tpu as pltpu

BETA = 0.9      # LIF membrane decay
THRESH = 1.0    # LIF firing threshold
BN_EPS = 1e-5


# ---------------------------------------------------------------------------
# Fused per-timestep kernel: Conv3x3+BN+LIF -> {Conv3x3+BN+LIF, Conv1x1} sum
# ---------------------------------------------------------------------------
def make_fused_kernel(img_w, hw):
    """Build the fused kernel; img_w / hw are static (needed for tap shifts)."""
    taps = [(ky, kx) for ky in range(3) for kx in range(3)]

    def conv3x3_taps(x, w_ref, masks):
        """3x3 conv (padding=1) as 9 shifted matmuls accumulated in f32.

        x:      (Cin, HW)   activation, HW on the lane axis
        w_ref:  (9, Cout, Cin) per-tap weight matrices (BN folded in)
        masks:  (9, HW)     zero-padding validity masks per tap
        """
        acc = None
        for k, (ky, kx) in enumerate(taps):
            shift = (ky - 1) * img_w + (kx - 1)     # flat source offset
            if shift == 0:
                xs = x                               # center tap: no shift/mask
            else:
                # xs[c, n] = x[c, (n + shift) % HW], then zero invalid taps
                xs = pltpu.roll(x, shift=(-shift) % hw, axis=1)
                xs = xs * masks[k:k + 1, :]
            contrib = jnp.dot(w_ref[k], xs, preferred_element_type=jnp.float32)
            acc = contrib if acc is None else acc + contrib
        return acc

    def kernel(x_ref, masks_ref, w1_ref, b1_ref, w2_ref, b2_ref, w3_ref, b3_ref,
               out_ref, mem1_ref, mem2_ref):
        t = pl.program_id(1)

        # Membrane state is VMEM-resident across the (sequential) T axis.
        @pl.when(t == 0)
        def _init():
            mem1_ref[...] = jnp.zeros_like(mem1_ref)
            mem2_ref[...] = jnp.zeros_like(mem2_ref)

        x = x_ref[0]              # (Cin, HW)
        masks = masks_ref[...]    # (9, HW)

        # ---- layer 1: Conv3x3 (+ folded BN/bias) -> LIF (stateful) ----
        y1 = conv3x3_taps(x, w1_ref, masks) + b1_ref[...]
        mem1 = BETA * mem1_ref[...] + y1
        spk1 = (mem1 > THRESH).astype(jnp.float32)
        mem1_ref[...] = mem1 - spk1 * THRESH         # soft reset

        # ---- nested BlockGen (branches summed) ----
        # branch A: Conv3x3 (+ folded BN/bias) -> LIF (stateful)
        y2 = conv3x3_taps(spk1, w2_ref, masks) + b2_ref[...]
        mem2 = BETA * mem2_ref[...] + y2
        spk2 = (mem2 > THRESH).astype(jnp.float32)
        mem2_ref[...] = mem2 - spk2 * THRESH
        # branch B: Conv1x1, fused with the branch sum (stack().sum(0))
        branch_b = jnp.dot(w3_ref[...], spk1,
                           preferred_element_type=jnp.float32) + b3_ref[...]
        out_ref[0] = spk2 + branch_b

    return kernel


# ---------------------------------------------------------------------------
# Model forward: one pallas_call over grid (B, T)
# ---------------------------------------------------------------------------
@jax.jit
def model_forward(X, masks, w1, b1, w2, b2, w3, b3):
    """X: [T, B, Cin, H, W] -> Y: [T, B, Cout, H, W]."""
    T, B, Cin, H, Wd = X.shape
    C1 = w1.shape[1]
    HW = H * Wd
    # TODO(synk): requires H*W % 128 == 0 for lane-dense blocks; generic
    # shapes would need padding of the spatial axis.
    assert HW % 128 == 0

    # Single layout pass: NCHW -> (T, C, B*H*W), channels on sublanes,
    # flattened spatial (per image, row-major) on the lane axis.
    x_cn = jnp.transpose(X, (0, 2, 1, 3, 4)).reshape(T, Cin, B * HW)

    kernel = make_fused_kernel(Wd, HW)

    y_cn = pl.pallas_call(
        kernel,
        out_shape=jax.ShapeDtypeStruct((T, C1, B * HW), jnp.float32),
        grid=(B, T),
        in_specs=[
            pl.BlockSpec((1, Cin, HW), lambda b, t: (t, 0, b)),   # x[t, :, img b]
            pl.BlockSpec((9, HW), lambda b, t: (0, 0)),           # tap masks
            pl.BlockSpec((9, C1, Cin), lambda b, t: (0, 0, 0)),   # conv1 taps
            pl.BlockSpec((C1, 1), lambda b, t: (0, 0)),           # conv1 bias'
            pl.BlockSpec((9, C1, C1), lambda b, t: (0, 0, 0)),    # conv2 taps
            pl.BlockSpec((C1, 1), lambda b, t: (0, 0)),           # conv2 bias'
            pl.BlockSpec((C1, C1), lambda b, t: (0, 0)),          # conv 1x1
            pl.BlockSpec((C1, 1), lambda b, t: (0, 0)),           # conv 1x1 bias
        ],
        out_specs=pl.BlockSpec((1, C1, HW), lambda b, t: (t, 0, b)),
        scratch_shapes=[pltpu.VMEM((C1, HW), jnp.float32),        # mem1
                        pltpu.VMEM((C1, HW), jnp.float32)],       # mem2
        compiler_params=pltpu.CompilerParams(
            dimension_semantics=("parallel", "arbitrary")),
    )(x_cn, masks, w1, b1, w2, b2, w3, b3)

    # Single layout pass back to NCHW.
    return jnp.transpose(y_cn.reshape(T, C1, B, H, Wd), (0, 2, 1, 3, 4))


# ---------------------------------------------------------------------------
# Host-side parameter prep (layout plumbing only)
# ---------------------------------------------------------------------------
def make_tap_masks(H, W):
    """(9, H*W) validity masks for the 3x3 taps (zero padding, stride 1)."""
    n = jnp.arange(H * W)
    y = n // W
    x = n % W
    rows = []
    for ky in range(3):
        for kx in range(3):
            oy, ox = ky - 1, kx - 1
            valid = ((y + oy >= 0) & (y + oy < H) &
                     (x + ox >= 0) & (x + ox < W))
            rows.append(valid.astype(jnp.float32))
    return jnp.stack(rows, axis=0)


def fold_bn(w_oihw, b_o, gamma, beta, mean, var):
    """Fold eval-mode BatchNorm2d into conv weight/bias (exact)."""
    scale = gamma / jnp.sqrt(var + BN_EPS)
    shift = beta - mean * scale
    return w_oihw * scale[:, None, None, None], b_o * scale + shift


def pack_3x3(w_oihw):
    """(Cout, Cin, 3, 3) -> (9, Cout, Cin), tap index k = ky*3 + kx."""
    cout, cin = w_oihw.shape[0], w_oihw.shape[1]
    return jnp.transpose(w_oihw, (2, 3, 0, 1)).reshape(9, cout, cin)


# ---------------------------------------------------------------------------
if __name__ == "__main__":
    key = jax.random.PRNGKey(0)
    T, B, Cin, H, W = 4, 2, 2, 16, 16        # ModelGen default in_channels=2
    C1 = 8
    k1, k2, k3, kx = jax.random.split(key, 4)

    # Conv2d weights: kaiming_normal_(mode='fan_out', nonlinearity='relu'),
    # bias = 0 (as in ModelGen.__init__), PyTorch OIHW layout.
    def kaiming(k, cout, cin, kh, kw):
        std = (2.0 / (cout * kh * kw)) ** 0.5
        return jax.random.normal(k, (cout, cin, kh, kw), jnp.float32) * std

    w1_pt = kaiming(k1, C1, Cin, 3, 3); b1_pt = jnp.zeros((C1,), jnp.float32)
    w2_pt = kaiming(k2, C1, C1, 3, 3); b2_pt = jnp.zeros((C1,), jnp.float32)
    w3_pt = kaiming(k3, C1, C1, 1, 1); b3_pt = jnp.zeros((C1,), jnp.float32)

    # BatchNorm2d (eval): weight=1, bias=0, running_mean=0, running_var=1;
    # each Norm layer gets its own params, folded into its conv.
    ones_c = jnp.ones((C1,), jnp.float32)
    zeros_c = jnp.zeros((C1,), jnp.float32)
    w1_f, b1_f = fold_bn(w1_pt, b1_pt, ones_c, zeros_c, zeros_c, ones_c)
    w2_f, b2_f = fold_bn(w2_pt, b2_pt, ones_c, zeros_c, zeros_c, ones_c)

    # Pack for the kernel's (Cout, N) compute layout.
    w1_k = pack_3x3(w1_f); b1_k = b1_f.reshape(C1, 1)
    w2_k = pack_3x3(w2_f); b2_k = b2_f.reshape(C1, 1)
    w3_k = w3_pt[:, :, 0, 0]; b3_k = b3_pt.reshape(C1, 1)

    masks = make_tap_masks(H, W)

    X = jax.random.normal(kx, (T, B, Cin, H, W), jnp.float32)

    Y = model_forward(X, masks, w1_k, b1_k, w2_k, b2_k, w3_k, b3_k)
    Y = jax.block_until_ready(Y)
    assert Y.shape == (T, B, C1, H, W)
    assert bool(jnp.all(jnp.isfinite(Y)))
    print("KERNEL_OK")
</pallas_src>

<mosaic_0001>
module attributes {stable_mosaic.version = 11 : i64} {
  func.func @kernel(%arg0: i32, %arg1: i32, %arg2: memref<1x2x256xf32, #tpu.memory_space<vmem>>, %arg3: memref<9x256xf32, #tpu.memory_space<vmem>>, %arg4: memref<9x8x2xf32, #tpu.memory_space<vmem>>, %arg5: memref<8x1xf32, #tpu.memory_space<vmem>>, %arg6: memref<9x8x8xf32, #tpu.memory_space<vmem>>, %arg7: memref<8x1xf32, #tpu.memory_space<vmem>>, %arg8: memref<8x8xf32, #tpu.memory_space<vmem>>, %arg9: memref<8x1xf32, #tpu.memory_space<vmem>>, %arg10: memref<1x8x256xf32, #tpu.memory_space<vmem>>, %arg11: memref<8x256xf32, #tpu.memory_space<vmem>>, %arg12: memref<8x256xf32, #tpu.memory_space<vmem>>) attributes {dimension_semantics = [#tpu.dimension_semantics<parallel>, #tpu.dimension_semantics<arbitrary>], iteration_bounds = array<i64: 2, 4>, scalar_prefetch = 0 : i64, scratch_operands = 2 : i64, tpu.core_type = #tpu.core_type<tc>, window_params = [{transform_indices = @transform_0, window_bounds = array<i64: 1, 2, 256>}, {pipeline_mode = #tpu.pipeline_mode<synchronous>, transform_indices = @transform_1, window_bounds = array<i64: 9, 256>}, {pipeline_mode = #tpu.pipeline_mode<synchronous>, transform_indices = @transform_2, window_bounds = array<i64: 9, 8, 2>}, {pipeline_mode = #tpu.pipeline_mode<synchronous>, transform_indices = @transform_3, window_bounds = array<i64: 8, 1>}, {pipeline_mode = #tpu.pipeline_mode<synchronous>, transform_indices = @transform_4, window_bounds = array<i64: 9, 8, 8>}, {pipeline_mode = #tpu.pipeline_mode<synchronous>, transform_indices = @transform_5, window_bounds = array<i64: 8, 1>}, {pipeline_mode = #tpu.pipeline_mode<synchronous>, transform_indices = @transform_6, window_bounds = array<i64: 8, 8>}, {pipeline_mode = #tpu.pipeline_mode<synchronous>, transform_indices = @transform_7, window_bounds = array<i64: 8, 1>}, {transform_indices = @transform_8, window_bounds = array<i64: 1, 8, 256>}]} {
    %c0_i32 = arith.constant 0 : i32
    %0 = arith.cmpi eq, %arg1, %c0_i32 : i32
    %1 = arith.extui %0 : i1 to i32
    %c0_i32_0 = arith.constant 0 : i32
    %2 = arith.cmpi ne, %1, %c0_i32_0 : i32
    scf.if %2 {
      %cst_102 = arith.constant 0.000000e+00 : f32
      %179 = vector.broadcast %cst_102 : f32 to vector<8x256xf32>
      %c0_103 = arith.constant 0 : index
      %c0_104 = arith.constant 0 : index
      %180 = vector.load %arg11[%c0_103, %c0_104] : memref<8x256xf32, #tpu.memory_space<vmem>>, vector<8x256xf32>
      tpu.vector_store %arg11[%c0_103, %c0_104], %179 {strides = array<i32>} : memref<8x256xf32, #tpu.memory_space<vmem>>, vector<8x256xf32>,
      %cst_105 = arith.constant 0.000000e+00 : f32
      %181 = vector.broadcast %cst_105 : f32 to vector<8x256xf32>
      %c0_106 = arith.constant 0 : index
      %c0_107 = arith.constant 0 : index
      %182 = vector.load %arg12[%c0_106, %c0_107] : memref<8x256xf32, #tpu.memory_space<vmem>>, vector<8x256xf32>
      tpu.vector_store %arg12[%c0_106, %c0_107], %181 {strides = array<i32>} : memref<8x256xf32, #tpu.memory_space<vmem>>, vector<8x256xf32>,
    } else {
    }
    %c0 = arith.constant 0 : index
    %c0_1 = arith.constant 0 : index
    %c0_2 = arith.constant 0 : index
    %3 = vector.load %arg2[%c0, %c0_1, %c0_2] : memref<1x2x256xf32, #tpu.memory_space<vmem>>, vector<1x2x256xf32>
    %4 = vector.shape_cast %3 : vector<1x2x256xf32> to vector<2x256xf32>
    %c0_3 = arith.constant 0 : index
    %c0_4 = arith.constant 0 : index
    %5 = vector.load %arg3[%c0_3, %c0_4] : memref<9x256xf32, #tpu.memory_space<vmem>>, vector<9x256xf32>
    %c17_i32 = arith.constant 17 : i32
    %6 = tpu.dynamic_rotate %4 by %c17_i32 dim 1 : vector<2x256xf32>, i32 -> vector<2x256xf32>
    %7 = vector.extract_strided_slice %5 {offsets = [0, 0], sizes = [1, 256], strides = [1, 1]} : vector<9x256xf32> to vector<1x256xf32>
    %8 = vector.broadcast %7 : vector<1x256xf32> to vector<2x256xf32>
    %9 = arith.mulf %6, %8 : vector<2x256xf32>
    %c0_5 = arith.constant 0 : index
    %c0_6 = arith.constant 0 : index
    %c0_7 = arith.constant 0 : index
    %10 = vector.load %arg4[%c0_5, %c0_6, %c0_7] : memref<9x8x2xf32, #tpu.memory_space<vmem>>, vector<1x8x2xf32>
    %11 = vector.shape_cast %10 : vector<1x8x2xf32> to vector<8x2xf32>
    %cst = arith.constant dense<0.000000e+00> : vector<8x256xf32>
    %12 = tpu.matmul %11, %9, %cst {dimension_numbers = #tpu.dot_dimension_numbers<[1], [0], [0], [1], [0, 0, 1, 1], [], []>} : vector<8x2xf32>, vector<2x256xf32>, vector<8x256xf32> -> vector<8x256xf32>
    %c16_i32 = arith.constant 16 : i32
    %13 = tpu.dynamic_rotate %4 by %c16_i32 dim 1 : vector<2x256xf32>, i32 -> vector<2x256xf32>
    %14 = vector.extract_strided_slice %5 {offsets = [1, 0], sizes = [1, 256], strides = [1, 1]} : vector<9x256xf32> to vector<1x256xf32>
    %15 = vector.broadcast %14 : vector<1x256xf32> to vector<2x256xf32>
    %16 = arith.mulf %13, %15 : vector<2x256xf32>
    %c1 = arith.constant 1 : index
    %c0_8 = arith.constant 0 : index
    %c0_9 = arith.constant 0 : index
    %17 = vector.load %arg4[%c1, %c0_8, %c0_9] : memref<9x8x2xf32, #tpu.memory_space<vmem>>, vector<1x8x2xf32>
    %18 = vector.shape_cast %17 : vector<1x8x2xf32> to vector<8x2xf32>
    %cst_10 = arith.constant dense<0.000000e+00> : vector<8x256xf32>
    %19 = tpu.matmul %18, %16, %cst_10 {dimension_numbers = #tpu.dot_dimension_numbers<[1], [0], [0], [1], [0, 0, 1, 1], [], []>} : vector<8x2xf32>, vector<2x256xf32>, vector<8x256xf32> -> vector<8x256xf32>
    %20 = arith.addf %12, %19 : vector<8x256xf32>
    %c15_i32 = arith.constant 15 : i32
    %21 = tpu.dynamic_rotate %4 by %c15_i32 dim 1 : vector<2x256xf32>, i32 -> vector<2x256xf32>
    %22 = vector.extract_strided_slice %5 {offsets = [2, 0], sizes = [1, 256], strides = [1, 1]} : vector<9x256xf32> to vector<1x256xf32>
    %23 = vector.broadcast %22 : vector<1x256xf32> to vector<2x256xf32>
    %24 = arith.mulf %21, %23 : vector<2x256xf32>
    %c2 = arith.constant 2 : index
    %c0_11 = arith.constant 0 : index
    %c0_12 = arith.constant 0 : index
    %25 = vector.load %arg4[%c2, %c0_11, %c0_12] : memref<9x8x2xf32, #tpu.memory_space<vmem>>, vector<1x8x2xf32>
    %26 = vector.shape_cast %25 : vector<1x8x2xf32> to vector<8x2xf32>
    %cst_13 = arith.constant dense<0.000000e+00> : vector<8x256xf32>
    %27 = tpu.matmul %26, %24, %cst_13 {dimension_numbers = #tpu.dot_dimension_numbers<[1], [0], [0], [1], [0, 0, 1, 1], [], []>} : vector<8x2xf32>, vector<2x256xf32>, vector<8x256xf32> -> vector<8x256xf32>
    %28 = arith.addf %20, %27 : vector<8x256xf32>
    %c1_i32 = arith.constant 1 : i32
    %29 = tpu.dynamic_rotate %4 by %c1_i32 dim 1 : vector<2x256xf32>, i32 -> vector<2x256xf32>
    %30 = vector.extract_strided_slice %5 {offsets = [3, 0], sizes = [1, 256], strides = [1, 1]} : vector<9x256xf32> to vector<1x256xf32>
    %31 = vector.broadcast %30 : vector<1x256xf32> to vector<2x256xf32>
    %32 = arith.mulf %29, %31 : vector<2x256xf32>
    %c3 = arith.constant 3 : index
    %c0_14 = arith.constant 0 : index
    %c0_15 = arith.constant 0 : index
    %33 = vector.load %arg4[%c3, %c0_14, %c0_15] : memref<9x8x2xf32, #tpu.memory_space<vmem>>, vector<1x8x2xf32>
    %34 = vector.shape_cast %33 : vector<1x8x2xf32> to vector<8x2xf32>
    %cst_16 = arith.constant dense<0.000000e+00> : vector<8x256xf32>
    %35 = tpu.matmul %34, %32, %cst_16 {dimension_numbers = #tpu.dot_dimension_numbers<[1], [0], [0], [1], [0, 0, 1, 1], [], []>} : vector<8x2xf32>, vector<2x256xf32>, vector<8x256xf32> -> vector<8x256xf32>
    %36 = arith.addf %28, %35 : vector<8x256xf32>
    %c4 = arith.constant 4 : index
    %c0_17 = arith.constant 0 : index
    %c0_18 = arith.constant 0 : index
    %37 = vector.load %arg4[%c4, %c0_17, %c0_18] : memref<9x8x2xf32, #tpu.memory_space<vmem>>, vector<1x8x2xf32>
    %38 = vector.shape_cast %37 : vector<1x8x2xf32> to vector<8x2xf32>
    %cst_19 = arith.constant dense<0.000000e+00> : vector<8x256xf32>
    %39 = tpu.matmul %38, %4, %cst_19 {dimension_numbers = #tpu.dot_dimension_numbers<[1], [0], [0], [1], [0, 0, 1, 1], [], []>} : vector<8x2xf32>, vector<2x256xf32>, vector<8x256xf32> -> vector<8x256xf32>
    %40 = arith.addf %36, %39 : vector<8x256xf32>
    %c255_i32 = arith.constant 255 : i32
    %41 = tpu.dynamic_rotate %4 by %c255_i32 dim 1 : vector<2x256xf32>, i32 -> vector<2x256xf32>
    %42 = vector.extract_strided_slice %5 {offsets = [5, 0], sizes = [1, 256], strides = [1, 1]} : vector<9x256xf32> to vector<1x256xf32>
    %43 = vector.broadcast %42 : vector<1x256xf32> to vector<2x256xf32>
    %44 = arith.mulf %41, %43 : vector<2x256xf32>
    %c5 = arith.constant 5 : index
    %c0_20 = arith.constant 0 : index
    %c0_21 = arith.constant 0 : index
    %45 = vector.load %arg4[%c5, %c0_20, %c0_21] : memref<9x8x2xf32, #tpu.memory_space<vmem>>, vector<1x8x2xf32>
    %46 = vector.shape_cast %45 : vector<1x8x2xf32> to vector<8x2xf32>
    %cst_22 = arith.constant dense<0.000000e+00> : vector<8x256xf32>
    %47 = tpu.matmul %46, %44, %cst_22 {dimension_numbers = #tpu.dot_dimension_numbers<[1], [0], [0], [1], [0, 0, 1, 1], [], []>} : vector<8x2xf32>, vector<2x256xf32>, vector<8x256xf32> -> vector<8x256xf32>
    %48 = arith.addf %40, %47 : vector<8x256xf32>
    %c241_i32 = arith.constant 241 : i32
    %49 = tpu.dynamic_rotate %4 by %c241_i32 dim 1 : vector<2x256xf32>, i32 -> vector<2x256xf32>
    %50 = vector.extract_strided_slice %5 {offsets = [6, 0], sizes = [1, 256], strides = [1, 1]} : vector<9x256xf32> to vector<1x256xf32>
    %51 = vector.broadcast %50 : vector<1x256xf32> to vector<2x256xf32>
    %52 = arith.mulf %49, %51 : vector<2x256xf32>
    %c6 = arith.constant 6 : index
    %c0_23 = arith.constant 0 : index
    %c0_24 = arith.constant 0 : index
    %53 = vector.load %arg4[%c6, %c0_23, %c0_24] : memref<9x8x2xf32, #tpu.memory_space<vmem>>, vector<1x8x2xf32>
    %54 = vector.shape_cast %53 : vector<1x8x2xf32> to vector<8x2xf32>
    %cst_25 = arith.constant dense<0.000000e+00> : vector<8x256xf32>
    %55 = tpu.matmul %54, %52, %cst_25 {dimension_numbers = #tpu.dot_dimension_numbers<[1], [0], [0], [1], [0, 0, 1, 1], [], []>} : vector<8x2xf32>, vector<2x256xf32>, vector<8x256xf32> -> vector<8x256xf32>
    %56 = arith.addf %48, %55 : vector<8x256xf32>
    %c240_i32 = arith.constant 240 : i32
    %57 = tpu.dynamic_rotate %4 by %c240_i32 dim 1 : vector<2x256xf32>, i32 -> vector<2x256xf32>
    %58 = vector.extract_strided_slice %5 {offsets = [7, 0], sizes = [1, 256], strides = [1, 1]} : vector<9x256xf32> to vector<1x256xf32>
    %59 = vector.broadcast %58 : vector<1x256xf32> to vector<2x256xf32>
    %60 = arith.mulf %57, %59 : vector<2x256xf32>
    %c7 = arith.constant 7 : index
    %c0_26 = arith.constant 0 : index
    %c0_27 = arith.constant 0 : index
    %61 = vector.load %arg4[%c7, %c0_26, %c0_27] : memref<9x8x2xf32, #tpu.memory_space<vmem>>, vector<1x8x2xf32>
    %62 = vector.shape_cast %61 : vector<1x8x2xf32> to vector<8x2xf32>
    %cst_28 = arith.constant dense<0.000000e+00> : vector<8x256xf32>
    %63 = tpu.matmul %62, %60, %cst_28 {dimension_numbers = #tpu.dot_dimension_numbers<[1], [0], [0], [1], [0, 0, 1, 1], [], []>} : vector<8x2xf32>, vector<2x256xf32>, vector<8x256xf32> -> vector<8x256xf32>
    %64 = arith.addf %56, %63 : vector<8x256xf32>
    %c239_i32 = arith.constant 239 : i32
    %65 = tpu.dynamic_rotate %4 by %c239_i32 dim 1 : vector<2x256xf32>, i32 -> vector<2x256xf32>
    %66 = vector.extract_strided_slice %5 {offsets = [8, 0], sizes = [1, 256], strides = [1, 1]} : vector<9x256xf32> to vector<1x256xf32>
    %67 = vector.broadcast %66 : vector<1x256xf32> to vector<2x256xf32>
    %68 = arith.mulf %65, %67 : vector<2x256xf32>
    %c8 = arith.constant 8 : index
    %c0_29 = arith.constant 0 : index
    %c0_30 = arith.constant 0 : index
    %69 = vector.load %arg4[%c8, %c0_29, %c0_30] : memref<9x8x2xf32, #tpu.memory_space<vmem>>, vector<1x8x2xf32>
    %70 = vector.shape_cast %69 : vector<1x8x2xf32> to vector<8x2xf32>
    %cst_31 = arith.constant dense<0.000000e+00> : vector<8x256xf32>
    %71 = tpu.matmul %70, %68, %cst_31 {dimension_numbers = #tpu.dot_dimension_numbers<[1], [0], [0], [1], [0, 0, 1, 1], [], []>} : vector<8x2xf32>, vector<2x256xf32>, vector<8x256xf32> -> vector<8x256xf32>
    %72 = arith.addf %64, %71 : vector<8x256xf32>
    %c0_32 = arith.constant 0 : index
    %c0_33 = arith.constant 0 : index
    %73 = vector.load %arg5[%c0_32, %c0_33] : memref<8x1xf32, #tpu.memory_space<vmem>>, vector<8x1xf32>
    %74 = vector.broadcast %73 : vector<8x1xf32> to vector<8x256xf32>
    %75 = arith.addf %72, %74 : vector<8x256xf32>
    %c0_34 = arith.constant 0 : index
    %c0_35 = arith.constant 0 : index
    %76 = vector.load %arg11[%c0_34, %c0_35] : memref<8x256xf32, #tpu.memory_space<vmem>>, vector<8x256xf32>
    %cst_36 = arith.constant 0.899999976 : f32
    %77 = vector.broadcast %cst_36 : f32 to vector<8x256xf32>
    %78 = arith.mulf %77, %76 : vector<8x256xf32>
    %79 = arith.addf %78, %75 : vector<8x256xf32>
    %cst_37 = arith.constant 1.000000e+00 : f32
    %80 = vector.broadcast %cst_37 : f32 to vector<8x256xf32>
    %81 = arith.cmpf ogt, %79, %80 : vector<8x256xf32>
    %82 = arith.extui %81 : vector<8x256xi1> to vector<8x256xi32>
    %83 = arith.sitofp %82 : vector<8x256xi32> to vector<8x256xf32>
    %cst_38 = arith.constant 1.000000e+00 : f32
    %84 = vector.broadcast %cst_38 : f32 to vector<8x256xf32>
    %85 = arith.mulf %83, %84 : vector<8x256xf32>
    %86 = arith.subf %79, %85 : vector<8x256xf32>
    %c0_39 = arith.constant 0 : index
    %c0_40 = arith.constant 0 : index
    %87 = vector.load %arg11[%c0_39, %c0_40] : memref<8x256xf32, #tpu.memory_space<vmem>>, vector<8x256xf32>
    tpu.vector_store %arg11[%c0_39, %c0_40], %86 {strides = array<i32>} : memref<8x256xf32, #tpu.memory_space<vmem>>, vector<8x256xf32>,
    %c17_i32_41 = arith.constant 17 : i32
    %88 = tpu.dynamic_rotate %83 by %c17_i32_41 dim 1 : vector<8x256xf32>, i32 -> vector<8x256xf32>
    %89 = vector.extract_strided_slice %5 {offsets = [0, 0], sizes = [1, 256], strides = [1, 1]} : vector<9x256xf32> to vector<1x256xf32>
    %90 = vector.broadcast %89 : vector<1x256xf32> to vector<8x256xf32>
    %91 = arith.mulf %88, %90 : vector<8x256xf32>
    %c0_42 = arith.constant 0 : index
    %c0_43 = arith.constant 0 : index
    %c0_44 = arith.constant 0 : index
    %92 = vector.load %arg6[%c0_42, %c0_43, %c0_44] : memref<9x8x8xf32, #tpu.memory_space<vmem>>, vector<1x8x8xf32>
    %93 = vector.shape_cast %92 : vector<1x8x8xf32> to vector<8x8xf32>
    %cst_45 = arith.constant dense<0.000000e+00> : vector<8x256xf32>
    %94 = tpu.matmul %93, %91, %cst_45 {dimension_numbers = #tpu.dot_dimension_numbers<[1], [0], [0], [1], [0, 0, 1, 1], [], []>} : vector<8x8xf32>, vector<8x256xf32>, vector<8x256xf32> -> vector<8x256xf32>
    %c16_i32_46 = arith.constant 16 : i32
    %95 = tpu.dynamic_rotate %83 by %c16_i32_46 dim 1 : vector<8x256xf32>, i32 -> vector<8x256xf32>
    %96 = vector.extract_strided_slice %5 {offsets = [1, 0], sizes = [1, 256], strides = [1, 1]} : vector<9x256xf32> to vector<1x256xf32>
    %97 = vector.broadcast %96 : vector<1x256xf32> to vector<8x256xf32>
    %98 = arith.mulf %95, %97 : vector<8x256xf32>
    %c1_47 = arith.constant 1 : index
    %c0_48 = arith.constant 0 : index
    %c0_49 = arith.constant 0 : index
    %99 = vector.load %arg6[%c1_47, %c0_48, %c0_49] : memref<9x8x8xf32, #tpu.memory_space<vmem>>, vector<1x8x8xf32>
    %100 = vector.shape_cast %99 : vector<1x8x8xf32> to vector<8x8xf32>
    %cst_50 = arith.constant dense<0.000000e+00> : vector<8x256xf32>
    %101 = tpu.matmul %100, %98, %cst_50 {dimension_numbers = #tpu.dot_dimension_numbers<[1], [0], [0], [1], [0, 0, 1, 1], [], []>} : vector<8x8xf32>, vector<8x256xf32>, vector<8x256xf32> -> vector<8x256xf32>
    %102 = arith.addf %94, %101 : vector<8x256xf32>
    %c15_i32_51 = arith.constant 15 : i32
    %103 = tpu.dynamic_rotate %83 by %c15_i32_51 dim 1 : vector<8x256xf32>, i32 -> vector<8x256xf32>
    %104 = vector.extract_strided_slice %5 {offsets = [2, 0], sizes = [1, 256], strides = [1, 1]} : vector<9x256xf32> to vector<1x256xf32>
    %105 = vector.broadcast %104 : vector<1x256xf32> to vector<8x256xf32>
    %106 = arith.mulf %103, %105 : vector<8x256xf32>
    %c2_52 = arith.constant 2 : index
    %c0_53 = arith.constant 0 : index
    %c0_54 = arith.constant 0 : index
    %107 = vector.load %arg6[%c2_52, %c0_53, %c0_54] : memref<9x8x8xf32, #tpu.memory_space<vmem>>, vector<1x8x8xf32>
    %108 = vector.shape_cast %107 : vector<1x8x8xf32> to vector<8x8xf32>
    %cst_55 = arith.constant dense<0.000000e+00> : vector<8x256xf32>
    %109 = tpu.matmul %108, %106, %cst_55 {dimension_numbers = #tpu.dot_dimension_numbers<[1], [0], [0], [1], [0, 0, 1, 1], [], []>} : vector<8x8xf32>, vector<8x256xf32>, vector<8x256xf32> -> vector<8x256xf32>
    %110 = arith.addf %102, %109 : vector<8x256xf32>
    %c1_i32_56 = arith.constant 1 : i32
    %111 = tpu.dynamic_rotate %83 by %c1_i32_56 dim 1 : vector<8x256xf32>, i32 -> vector<8x256xf32>
    %112 = vector.extract_strided_slice %5 {offsets = [3, 0], sizes = [1, 256], strides = [1, 1]} : vector<9x256xf32> to vector<1x256xf32>
    %113 = vector.broadcast %112 : vector<1x256xf32> to vector<8x256xf32>
    %114 = arith.mulf %111, %113 : vector<8x256xf32>
    %c3_57 = arith.constant 3 : index
    %c0_58 = arith.constant 0 : index
    %c0_59 = arith.constant 0 : index
    %115 = vector.load %arg6[%c3_57, %c0_58, %c0_59] : memref<9x8x8xf32, #tpu.memory_space<vmem>>, vector<1x8x8xf32>
    %116 = vector.shape_cast %115 : vector<1x8x8xf32> to vector<8x8xf32>
    %cst_60 = arith.constant dense<0.000000e+00> : vector<8x256xf32>
    %117 = tpu.matmul %116, %114, %cst_60 {dimension_numbers = #tpu.dot_dimension_numbers<[1], [0], [0], [1], [0, 0, 1, 1], [], []>} : vector<8x8xf32>, vector<8x256xf32>, vector<8x256xf32> -> vector<8x256xf32>
    %118 = arith.addf %110, %117 : vector<8x256xf32>
    %c4_61 = arith.constant 4 : index
    %c0_62 = arith.constant 0 : index
    %c0_63 = arith.constant 0 : index
    %119 = vector.load %arg6[%c4_61, %c0_62, %c0_63] : memref<9x8x8xf32, #tpu.memory_space<vmem>>, vector<1x8x8xf32>
    %120 = vector.shape_cast %119 : vector<1x8x8xf32> to vector<8x8xf32>
    %cst_64 = arith.constant dense<0.000000e+00> : vector<8x256xf32>
    %121 = tpu.matmul %120, %83, %cst_64 {dimension_numbers = #tpu.dot_dimension_numbers<[1], [0], [0], [1], [0, 0, 1, 1], [], []>} : vector<8x8xf32>, vector<8x256xf32>, vector<8x256xf32> -> vector<8x256xf32>
    %122 = arith.addf %118, %121 : vector<8x256xf32>
    %c255_i32_65 = arith.constant 255 : i32
    %123 = tpu.dynamic_rotate %83 by %c255_i32_65 dim 1 : vector<8x256xf32>, i32 -> vector<8x256xf32>
    %124 = vector.extract_strided_slice %5 {offsets = [5, 0], sizes = [1, 256], strides = [1, 1]} : vector<9x256xf32> to vector<1x256xf32>
    %125 = vector.broadcast %124 : vector<1x256xf32> to vector<8x256xf32>
    %126 = arith.mulf %123, %125 : vector<8x256xf32>
    %c5_66 = arith.constant 5 : index
    %c0_67 = arith.constant 0 : index
    %c0_68 = arith.constant 0 : index
    %127 = vector.load %arg6[%c5_66, %c0_67, %c0_68] : memref<9x8x8xf32, #tpu.memory_space<vmem>>, vector<1x8x8xf32>
    %128 = vector.shape_cast %127 : vector<1x8x8xf32> to vector<8x8xf32>
    %cst_69 = arith.constant dense<0.000000e+00> : vector<8x256xf32>
    %129 = tpu.matmul %128, %126, %cst_69 {dimension_numbers = #tpu.dot_dimension_numbers<[1], [0], [0], [1], [0, 0, 1, 1], [], []>} : vector<8x8xf32>, vector<8x256xf32>, vector<8x256xf32> -> vector<8x256xf32>
    %130 = arith.addf %122, %129 : vector<8x256xf32>
    %c241_i32_70 = arith.constant 241 : i32
    %131 = tpu.dynamic_rotate %83 by %c241_i32_70 dim 1 : vector<8x256xf32>, i32 -> vector<8x256xf32>
    %132 = vector.extract_strided_slice %5 {offsets = [6, 0], sizes = [1, 256], strides = [1, 1]} : vector<9x256xf32> to vector<1x256xf32>
    %133 = vector.broadcast %132 : vector<1x256xf32> to vector<8x256xf32>
    %134 = arith.mulf %131, %133 : vector<8x256xf32>
    %c6_71 = arith.constant 6 : index
    %c0_72 = arith.constant 0 : index
    %c0_73 = arith.constant 0 : index
    %135 = vector.load %arg6[%c6_71, %c0_72, %c0_73] : memref<9x8x8xf32, #tpu.memory_space<vmem>>, vector<1x8x8xf32>
    %136 = vector.shape_cast %135 : vector<1x8x8xf32> to vector<8x8xf32>
    %cst_74 = arith.constant dense<0.000000e+00> : vector<8x256xf32>
    %137 = tpu.matmul %136, %134, %cst_74 {dimension_numbers = #tpu.dot_dimension_numbers<[1], [0], [0], [1], [0, 0, 1, 1], [], []>} : vector<8x8xf32>, vector<8x256xf32>, vector<8x256xf32> -> vector<8x256xf32>
    %138 = arith.addf %130, %137 : vector<8x256xf32>
    %c240_i32_75 = arith.constant 240 : i32
    %139 = tpu.dynamic_rotate %83 by %c240_i32_75 dim 1 : vector<8x256xf32>, i32 -> vector<8x256xf32>
    %140 = vector.extract_strided_slice %5 {offsets = [7, 0], sizes = [1, 256], strides = [1, 1]} : vector<9x256xf32> to vector<1x256xf32>
    %141 = vector.broadcast %140 : vector<1x256xf32> to vector<8x256xf32>
    %142 = arith.mulf %139, %141 : vector<8x256xf32>
    %c7_76 = arith.constant 7 : index
    %c0_77 = arith.constant 0 : index
    %c0_78 = arith.constant 0 : index
    %143 = vector.load %arg6[%c7_76, %c0_77, %c0_78] : memref<9x8x8xf32, #tpu.memory_space<vmem>>, vector<1x8x8xf32>
    %144 = vector.shape_cast %143 : vector<1x8x8xf32> to vector<8x8xf32>
    %cst_79 = arith.constant dense<0.000000e+00> : vector<8x256xf32>
    %145 = tpu.matmul %144, %142, %cst_79 {dimension_numbers = #tpu.dot_dimension_numbers<[1], [0], [0], [1], [0, 0, 1, 1], [], []>} : vector<8x8xf32>, vector<8x256xf32>, vector<8x256xf32> -> vector<8x256xf32>
    %146 = arith.addf %138, %145 : vector<8x256xf32>
    %c239_i32_80 = arith.constant 239 : i32
    %147 = tpu.dynamic_rotate %83 by %c239_i32_80 dim 1 : vector<8x256xf32>, i32 -> vector<8x256xf32>
    %148 = vector.extract_strided_slice %5 {offsets = [8, 0], sizes = [1, 256], strides = [1, 1]} : vector<9x256xf32> to vector<1x256xf32>
    %149 = vector.broadcast %148 : vector<1x256xf32> to vector<8x256xf32>
    %150 = arith.mulf %147, %149 : vector<8x256xf32>
    %c8_81 = arith.constant 8 : index
    %c0_82 = arith.constant 0 : index
    %c0_83 = arith.constant 0 : index
    %151 = vector.load %arg6[%c8_81, %c0_82, %c0_83] : memref<9x8x8xf32, #tpu.memory_space<vmem>>, vector<1x8x8xf32>
    %152 = vector.shape_cast %151 : vector<1x8x8xf32> to vector<8x8xf32>
    %cst_84 = arith.constant dense<0.000000e+00> : vector<8x256xf32>
    %153 = tpu.matmul %152, %150, %cst_84 {dimension_numbers = #tpu.dot_dimension_numbers<[1], [0], [0], [1], [0, 0, 1, 1], [], []>} : vector<8x8xf32>, vector<8x256xf32>, vector<8x256xf32> -> vector<8x256xf32>
    %154 = arith.addf %146, %153 : vector<8x256xf32>
    %c0_85 = arith.constant 0 : index
    %c0_86 = arith.constant 0 : index
    %155 = vector.load %arg7[%c0_85, %c0_86] : memref<8x1xf32, #tpu.memory_space<vmem>>, vector<8x1xf32>
    %156 = vector.broadcast %155 : vector<8x1xf32> to vector<8x256xf32>
    %157 = arith.addf %154, %156 : vector<8x256xf32>
    %c0_87 = arith.constant 0 : index
    %c0_88 = arith.constant 0 : index
    %158 = vector.load %arg12[%c0_87, %c0_88] : memref<8x256xf32, #tpu.memory_space<vmem>>, vector<8x256xf32>
    %cst_89 = arith.constant 0.899999976 : f32
    %159 = vector.broadcast %cst_89 : f32 to vector<8x256xf32>
    %160 = arith.mulf %159, %158 : vector<8x256xf32>
    %161 = arith.addf %160, %157 : vector<8x256xf32>
    %cst_90 = arith.constant 1.000000e+00 : f32
    %162 = vector.broadcast %cst_90 : f32 to vector<8x256xf32>
    %163 = arith.cmpf ogt, %161, %162 : vector<8x256xf32>
    %164 = arith.extui %163 : vector<8x256xi1> to vector<8x256xi32>
    %165 = arith.sitofp %164 : vector<8x256xi32> to vector<8x256xf32>
    %cst_91 = arith.constant 1.000000e+00 : f32
    %166 = vector.broadcast %cst_91 : f32 to vector<8x256xf32>
    %167 = arith.mulf %165, %166 : vector<8x256xf32>
    %168 = arith.subf %161, %167 : vector<8x256xf32>
    %c0_92 = arith.constant 0 : index
    %c0_93 = arith.constant 0 : index
    %169 = vector.load %arg12[%c0_92, %c0_93] : memref<8x256xf32, #tpu.memory_space<vmem>>, vector<8x256xf32>
    tpu.vector_store %arg12[%c0_92, %c0_93], %168 {strides = array<i32>} : memref<8x256xf32, #tpu.memory_space<vmem>>, vector<8x256xf32>,
    %c0_94 = arith.constant 0 : index
    %c0_95 = arith.constant 0 : index
    %170 = vector.load %arg8[%c0_94, %c0_95] : memref<8x8xf32, #tpu.memory_space<vmem>>, vector<8x8xf32>
    %cst_96 = arith.constant dense<0.000000e+00> : vector<8x256xf32>
    %171 = tpu.matmul %170, %83, %cst_96 {dimension_numbers = #tpu.dot_dimension_numbers<[1], [0], [0], [1], [0, 0, 1, 1], [], []>} : vector<8x8xf32>, vector<8x256xf32>, vector<8x256xf32> -> vector<8x256xf32>
    %c0_97 = arith.constant 0 : index
    %c0_98 = arith.constant 0 : index
    %172 = vector.load %arg9[%c0_97, %c0_98] : memref<8x1xf32, #tpu.memory_space<vmem>>, vector<8x1xf32>
    %173 = vector.broadcast %172 : vector<8x1xf32> to vector<8x256xf32>
    %174 = arith.addf %171, %173 : vector<8x256xf32>
    %175 = arith.addf %165, %174 : vector<8x256xf32>
    %c0_99 = arith.constant 0 : index
    %c0_100 = arith.constant 0 : index
    %c0_101 = arith.constant 0 : index
    %176 = vector.load %arg10[%c0_99, %c0_100, %c0_101] : memref<1x8x256xf32, #tpu.memory_space<vmem>>, vector<1x8x256xf32>
    %177 = vector.shape_cast %176 : vector<1x8x256xf32> to vector<8x256xf32>
    %178 = vector.shape_cast %175 : vector<8x256xf32> to vector<1x8x256xf32>
    tpu.vector_store %arg10[%c0_99, %c0_100, %c0_101], %178 {strides = array<i32>} : memref<1x8x256xf32, #tpu.memory_space<vmem>>, vector<1x8x256xf32>,
    return
  }
  func.func @transform_0(%arg0: i32, %arg1: i32) -> (i32, i32, i32) {
    %c0_i32 = arith.constant 0 : i32
    %c0_i32_0 = arith.constant 0 : i32
    return %arg1, %c0_i32, %arg0 : i32, i32, i32
  }
  func.func @transform_1(%arg0: i32, %arg1: i32) -> (i32, i32) {
    %c0_i32 = arith.constant 0 : i32
    %c0_i32_0 = arith.constant 0 : i32
    %c0_i32_1 = arith.constant 0 : i32
    return %c0_i32, %c0_i32_0 : i32, i32
  }
  func.func @transform_2(%arg0: i32, %arg1: i32) -> (i32, i32, i32) {
    %c0_i32 = arith.constant 0 : i32
    %c0_i32_0 = arith.constant 0 : i32
    %c0_i32_1 = arith.constant 0 : i32
    %c0_i32_2 = arith.constant 0 : i32
    return %c0_i32, %c0_i32_0, %c0_i32_1 : i32, i32, i32
  }
  func.func @transform_3(%arg0: i32, %arg1: i32) -> (i32, i32) {
    %c0_i32 = arith.constant 0 : i32
    %c0_i32_0 = arith.constant 0 : i32
    %c0_i32_1 = arith.constant 0 : i32
    return %c0_i32, %c0_i32_0 : i32, i32
  }
  func.func @transform_4(%arg0: i32, %arg1: i32) -> (i32, i32, i32) {
    %c0_i32 = arith.constant 0 : i32
    %c0_i32_0 = arith.constant 0 : i32
    %c0_i32_1 = arith.constant 0 : i32
    %c0_i32_2 = arith.constant 0 : i32
    return %c0_i32, %c0_i32_0, %c0_i32_1 : i32, i32, i32
  }
  func.func @transform_5(%arg0: i32, %arg1: i32) -> (i32, i32) {
    %c0_i32 = arith.constant 0 : i32
    %c0_i32_0 = arith.constant 0 : i32
    %c0_i32_1 = arith.constant 0 : i32
    return %c0_i32, %c0_i32_0 : i32, i32
  }
  func.func @transform_6(%arg0: i32, %arg1: i32) -> (i32, i32) {
    %c0_i32 = arith.constant 0 : i32
    %c0_i32_0 = arith.constant 0 : i32
    %c0_i32_1 = arith.constant 0 : i32
    return %c0_i32, %c0_i32_0 : i32, i32
  }
  func.func @transform_7(%arg0: i32, %arg1: i32) -> (i32, i32) {
    %c0_i32 = arith.constant 0 : i32
    %c0_i32_0 = arith.constant 0 : i32
    %c0_i32_1 = arith.constant 0 : i32
    return %c0_i32, %c0_i32_0 : i32, i32
  }
  func.func @transform_8(%arg0: i32, %arg1: i32) -> (i32, i32, i32) {
    %c0_i32 = arith.constant 0 : i32
    %c0_i32_0 = arith.constant 0 : i32
    return %arg1, %c0_i32, %arg0 : i32, i32, i32
  }
}

</mosaic_0001>

<bundles_post_ra>
// kernel: model_forward.1
= control target key start
LH: loop header
LB: loop body
LE: loop exit
PB: predicated region body
PF: predicated region fallthrough
CT: control target
= control target key end

     0   :  { %s2512_s27 = smov 0   ;;  %s2514_s28 = smov 0   ;;  %s2938_s0 = inlined_call_operand.vmem [shape: f32[4,2,512], index: 0, kind: input, shape index: {}]   ;;  %s2939_s1 = inlined_call_operand.vmem [shape: f32[9,256], index: 1, kind: input, shape index: {}]   ;;  %s2940_s2 = inlined_call_operand.vmem [shape: f32[9,8,2], index: 2, kind: input, shape index: {}]   ;;  %s2941_s3 = inlined_call_operand.vmem [shape: f32[8,1], index: 3, kind: input, shape index: {}]   ;;  %s2942_s4 = inlined_call_operand.vmem [shape: f32[9,8,8], index: 4, kind: input, shape index: {}]   ;;  %s2943_s5 = inlined_call_operand.vmem [shape: f32[8,1], index: 5, kind: input, shape index: {}]   ;;  %s2944_s6 = inlined_call_operand.vmem [shape: f32[8,8], index: 6, kind: input, shape index: {}]   ;;  %s2945_s7 = inlined_call_operand.vmem [shape: f32[8,1], index: 7, kind: input, shape index: {}]   ;;  %s2946_s8 = inlined_call_operand.vmem [shape: f32[4,8,512], index: 8, kind: output, shape index: {}]  }
   0x1   :  { %s2516_s29 = smov 0   ;;  %s2518_s30 = smov 0  }
   0x2   :  { %s2520_s9 = smov 0  }
   0x3 LB: > { %s27_s10 = sadd.s32 1, %s2445_s29  ;;  %s30_s11 = sadd.s32 1, %s2449_s30  ;;  %s2453_s9 = sphi %s2520_s9, %s18_s9   ;;  %s2449_s30 = sphi %s2518_s30, %s2950_s30   ;;  %s2445_s29 = sphi %s2516_s29, %s2949_s29   ;;  %s2441_s28 = sphi %s2514_s28, %s2948_s28   ;;  %s2437_s27 = sphi %s2512_s27, %s2947_s27  }
   0x4   : > { %p28_p0 = scmp.ge.s32.totalorder %s27_s10, 4  ;;  %p2247_p1 = scmp.ge.s32.totalorder %s2453_s9, 1 }
   0x5   : > { %p283_p2 = scmp.lt.s32.totalorder %s2453_s9, 9 }
   0x6   : > { %s2952_s10 = smov (%p28_p0, %s27_s10), 0  ;;  %s2954_s11 = smov (!%p28_p0, %s30_s11), %s2449_s30 }
   0x7   : > { %p284_p3 = pnand %p2247_p1, %p283_p2  ;;  %p32_p4 = scmp.ge.s32.totalorder %s2954_s11, 2 }
   0x8   : > { %s2248_s12 = sshll.u32 (!%p284_p3), %s2441_s28, 1  ;;  %p326_p5 = scmp.lt.s32.totalorder (!%p284_p3), %s2437_s27, 3 }
   0x9   : > { %s2956_s11 = smov (%p32_p4, %s2954_s11), 0  ;;  %287 = sbr.rel (%p284_p3) target bundleno = 723 (0x2d3), region = 52 }
   0xa   : > { %p328_p6 = scmp.lt.s32.totalorder (!%p284_p3), %s2248_s12, 3  ;;  %p2254_p7 = scmp.ne.s32.totalorder (!%p284_p3), %s2437_s27, 0 }
   0xe   : > { %s327_s13 = scalar_select %p326_p5, %s2437_s27, 3 }
   0xf   : > { %s2958_s12 = smov (!%p328_p6, %s2248_s12), 3  ;;  %348 = sbr.rel (%p2254_p7) target bundleno = 23 (0x17), region = 56 }
  0x10   : > { %s2249_s14 = sshll.u32 %s327_s13, 2 }
  0x11   : > { %s331_s15 = sadd.s32 %s2249_s14, %s2958_s12 }
  0x12   : > { %s2250_s16 = sshll.u32 %s331_s15, 1  ;;  %s2253_s17 = sshll.u32 %s331_s15, 3 }
  0x13   : > { %s333_s20 = scalar_lea.vmem %s2938_s0, %s2250_s16  ;;  %s2548_s23 = scalar_lea.vmem %s2946_s8, %s2253_s17 }
  0x14   : > { %v2455_v0 = vmov 0.0  }
  0x15   : > { %349 = vst [vmem:[#allocation2] sm:$0xff] %v2455_v0  ;;  %350 = vst [vmem:[#allocation2 + $0x8] sm:$0xff] %v2455_v0 }
  0x16   : > { %351 = vst [vmem:[#allocation3 + $0x8] sm:$0xff] %v2455_v0  ;;  %352 = vst [vmem:[#allocation3] sm:$0xff] %v2455_v0 }
  0x17 PF: > { %v2550_v1 = vld.sshfl [vmem:[%s333_s20] sm:$0x33 pattern:$0x76325410]  ;;  %s2456_s24 = smov 17   ;;  %s2457_s25 = smov 16   ;;  %v373_v6 = vlaneseq }
  0x18   : > { %369 = vrot.lane.b32.xlu1 %v2550_v1, %s2456_s24  ;;  %389 = vrot.lane.b32.xlu0 %v2550_v1, %s2457_s25  ;;  %v2558_v2 = vcombine.high %v2550_v1, %v2550_v1  ;;  %v2458_v3 = vmov 0.0   ;;  %s2459_s26 = smov 15   ;;  %s2460_s27 = smov 1   ;;  %v2463_v4 = vmov 0   ;;  %v1258_v5 = vld [vmem:[%s2941_s3] sm:$0xff]  ;;  %v2607_v12 = vld [vmem:[%s2939_s1 + $0x8] sm:$0xff] }
  0x19   : > { %483 = vmatprep.mubr.f32.mxu0 %v2458_v3  ;;  %563 = vmatprep.mubr.f32.mxu1 %v2458_v3  ;;  %s2461_s28 = smov 127   ;;  %s2462_s12 = smov 113   ;;  %v2593_v7 = vshrl.u32 %v373_v6, 7  ;;  %v2595_v8 = vand.u32 127, %v373_v6  ;;  %v2602_v11 = vld [vmem:[%s2939_s1] sm:$0xff]  ;;  %vm412_vm2 = vcmask 1041408  }
  0x1a   : > { %2373 = vset.pattern.permute.xlu0 %v2463_v4  ;;  %2414 = vset.pattern.permute.xlu1 %v2463_v4  ;;  %s2464_s13 = smov 112   ;;  %s2465_s14 = smov 111   ;;  %v2256_v33 = vld [vmem:[%s2940_s2 + $0x8] sm:$0xff]  ;;  %vm408_vm4 = vcmask 15360   ;;  %v388_v34 = vld [vmem:[%s2940_s2] sm:$0xff]  ;;  %v2263_v44 = vld [vmem:[%s2940_s2 + $0x10] sm:$0xff] }
  0x1b   : > { %v380_v9 = vsub.s32 0, %v2593_v7  ;;  %v398_v10 = vsub.s32 1, %v2593_v7  ;;  %v579_v15 = vsub.s32 2, %v2593_v7  ;;  %vm375_vm0 = vcmp.lt.s32.totalorder %v2595_v8, 17  ;;  %v2267_v54 = vld [vmem:[%s2940_s2 + $0x18] sm:$0xff]  ;;  %v2271_v55 = vld [vmem:[%s2940_s2 + $0x20] sm:$0xff] }
  0x1c   : > { %371 = vrot.lane.b32.xlu1 %v2558_v2, %s2456_s24  ;;  %391 = vrot.lane.b32.xlu0 %v2558_v2, %s2457_s25  ;;  %vm393_vm1 = vcmp.lt.s32.totalorder %v2595_v8, 16  ;;  %vm574_vm3 = vcmp.lt.s32.totalorder %v2595_v8, 15  ;;  %v680_v24 = vsub.s32 3, %v2593_v7  ;;  %v863_v40 = vsub.s32 5, %v2593_v7 }
  0x1d   : > { %v2613_v16 = vrot.slane %v2602_v11, %v380_v9  ;;  %v2616_v17 = vrot.slane %v2602_v11, %v398_v10  ;;  %v2619_v18 = vrot.slane %v2607_v12, %v380_v9  ;;  %v2622_v19 = vrot.slane %v2607_v12, %v398_v10 }
  0x1e   : > { %v2626_v22 = vrot.slane %v2602_v11, %v579_v15  ;;  %v2629_v23 = vrot.slane %v2607_v12, %v579_v15  ;;  %v2659_v39 = vrot.slane %v2602_v11, %v680_v24  ;;  %vm675_vm5 = vcmp.lt.s32.totalorder %v2595_v8, 1 }
  0x1f   : > { %v2666_v43 = vrot.slane %v2607_v12, %v680_v24  ;;  %v2682_v49 = vrot.slane %v2602_v11, %v863_v40  ;;  %v964_v50 = vsub.s32 6, %v2593_v7  ;;  %vm858_vm6 = vcmp.lt.s32.totalorder %v2595_v8, 127 }
  0x20   : > { %572 = vrot.lane.b32.xlu1 %v2558_v2, %s2459_s26  ;;  %570 = vrot.lane.b32.xlu0 %v2550_v1, %s2459_s26  ;;  %v2689_v53 = vrot.slane %v2607_v12, %v863_v40  ;;  %vm959_vm7 = vcmp.lt.s32.totalorder %v2595_v8, 113  ;;  %v1065_v0 = vsub.s32 7, %v2593_v7  ;;  %vm1060_vm8 = vcmp.lt.s32.totalorder %v2595_v8, 112 }
  0x21   : > { %v2711_v60 = vrot.slane %v2602_v11, %v964_v50  ;;  %v2717_v63 = vrot.slane %v2607_v12, %v964_v50  ;;  %vm1161_vm9 = vcmp.lt.s32.totalorder %v2595_v8, 111  ;;  %vm1301_vm12 = vcmask 64512   ;;  %v2312_v8 = vld [vmem:[%s2942_s4 + $0x40] sm:$0xff] }
  0x22   : > { %v2737_v10 = vrot.slane %v2602_v11, %v1065_v0 }
  0x24   : > { %673 = vrot.lane.b32.xlu1 %v2558_v2, %s2460_s27  ;;  %671 = vrot.lane.b32.xlu0 %v2550_v1, %s2460_s27 }
  0x28   : > { %856 = vrot.lane.b32.xlu1 %v2558_v2, %s2461_s28  ;;  %854 = vrot.lane.b32.xlu0 %v2550_v1, %s2461_s28 }
  0x2c   : > { %957 = vrot.lane.b32.xlu1 %v2558_v2, %s2462_s12  ;;  %955 = vrot.lane.b32.xlu0 %v2550_v1, %s2462_s12 }
  0x30   : > { %1058 = vrot.lane.b32.xlu1 %v2558_v2, %s2464_s13  ;;  %1056 = vrot.lane.b32.xlu0 %v2550_v1, %s2464_s13 }
  0x34   : > { %1159 = vrot.lane.b32.xlu1 %v2558_v2, %s2465_s14  ;;  %1157 = vrot.lane.b32.xlu0 %v2550_v1, %s2465_s14 }
  0x38   : > { %1261 = vperm.xlu0 %2373, %v1258_v5  }
  0x8a   : > { %v370_v13 = vpop.permute.xlu1 %369  ;;  %v390_v14 = vpop.permute.xlu0 %389 }
  0x8e   : > { %v372_v20 = vpop.permute.xlu1 %371  ;;  %v392_v21 = vpop.permute.xlu0 %391 }
  0x8f   : > { %v376_v25 = vsel %vm375_vm0, %v370_v13, %v372_v20  ;;  %v377_v26 = vsel %vm375_vm0, %v372_v20, %v370_v13  ;;  %v394_v27 = vsel %vm393_vm1, %v390_v14, %v392_v21  ;;  %v395_v28 = vsel %vm393_vm1, %v392_v21, %v390_v14  ;;  %v2279_v14 = vld [vmem:[%s2940_s2 + $0x30] sm:$0xff] }
  0x90   : > { %v386_v29 = vmul.f32 %v2613_v16, %v377_v26  ;;  %v404_v30 = vmul.f32 %v2616_v17, %v395_v28  ;;  %v387_v31 = vmul.f32 %v2619_v18, %v376_v25  ;;  %v405_v32 = vmul.f32 %v2622_v19, %v394_v27  ;;  %v2759_v25 = vld [vmem:[%s2939_s1 + $0x10] ss:$0 sm:$0xff]  ;;  %v2764_v26 = vld [vmem:[%s2939_s1 + $0x18] ss:$0 sm:$0xff] }
  0x91   : > { %v2740_v13 = vrot.slane %v2607_v12, %v1065_v0  ;;  %v2283_v27 = vld [vmem:[%s2940_s2 + $0x38] sm:$0xff] }
  0x92   : > { %2260 = vmatprep.subr.msk.mxu1 %vm412_vm2, %v387_v31  ;;  %v573_v35 = vpop.permute.xlu1 %572  ;;  %2257 = vmatprep.subr.msk.mxu0 %vm412_vm2, %v405_v32  ;;  %v571_v36 = vpop.permute.xlu0 %570 }
  0x93   : > { %v575_v37 = vsel %vm574_vm3, %v571_v36, %v573_v35  ;;  %v576_v38 = vsel %vm574_vm3, %v573_v35, %v571_v36  ;;  %2258 = vmatpush1.msk.msra.mxu0 %vm412_vm2, %v404_v30  ;;  %2261 = vmatpush1.msk.msra.mxu1 %vm412_vm2, %v386_v29 }
  0x94   : > { %v585_v41 = vmul.f32 %v2626_v22, %v576_v38  ;;  %v586_v42 = vmul.f32 %v2629_v23, %v575_v37  ;;  %2259 = vmatmul.mubr.msk.f32.vlgmr.msra.gmra.mxu0 %vm408_vm4, %v2256_v33  ;;  %2262 = vmatmul.mubr.msk.f32.vlgmr.msra.gmra.mxu1 %vm408_vm4, %v388_v34  ;;  %v2289_v34 = vld [vmem:[%s2940_s2 + $0x40] sm:$0xff] }
  0x95   : > { %662 = vmatprep.mubr.f32.mxu0 %v2458_v3  ;;  %763 = vmatprep.mubr.f32.mxu1 %v2458_v3 }
  0x96   : > { %v674_v45 = vpop.permute.xlu1 %673  ;;  %2264 = vmatprep.subr.msk.mxu0 %vm412_vm2, %v586_v42  ;;  %v672_v46 = vpop.permute.xlu0 %671 }
  0x97   : > { %v676_v47 = vsel %vm675_vm5, %v672_v46, %v674_v45  ;;  %v677_v48 = vsel %vm675_vm5, %v674_v45, %v672_v46  ;;  %2265 = vmatpush1.msk.msra.mxu0 %vm412_vm2, %v585_v41 }
  0x98   : > { %v686_v51 = vmul.f32 %v2659_v39, %v677_v48  ;;  %v687_v52 = vmul.f32 %v2666_v43, %v676_v47  ;;  %2266 = vmatmul.mubr.msk.f32.vlgmr.msra.gmra.mxu0 %vm408_vm4, %v2263_v44  ;;  %2272 = vmatprep.subr.msk.mxu0 %vm412_vm2, %v2558_v2 }
  0x99   : > { %2273 = vmatpush1.msk.msra.mxu0 %vm412_vm2, %v2550_v1  ;;  %845 = vmatprep.mubr.f32.mxu0 %v2458_v3  ;;  %v2275_v1 = vld [vmem:[%s2940_s2 + $0x28] sm:$0xff] }
  0x9a   : > { %v857_v56 = vpop.permute.xlu1 %856  ;;  %2268 = vmatprep.subr.msk.mxu1 %vm412_vm2, %v687_v52  ;;  %v855_v57 = vpop.permute.xlu0 %854 }
  0x9b   : > { %v859_v58 = vsel %vm858_vm6, %v855_v57, %v857_v56  ;;  %v860_v59 = vsel %vm858_vm6, %v857_v56, %v855_v57  ;;  %2269 = vmatpush1.msk.msra.mxu1 %vm412_vm2, %v686_v51 }
  0x9c   : > { %v869_v61 = vmul.f32 %v2682_v49, %v859_v58  ;;  %v870_v62 = vmul.f32 %v2689_v53, %v860_v59  ;;  %2270 = vmatmul.mubr.msk.f32.vlgmr.msra.gmra.mxu1 %vm408_vm4, %v2267_v54  ;;  %2274 = vmatmul.mubr.msk.f32.vlgmr.msra.gmra.mxu0 %vm408_vm4, %v2271_v55 }
  0x9d   : > { %946 = vmatprep.mubr.f32.mxu1 %v2458_v3  ;;  %1047 = vmatprep.mubr.f32.mxu0 %v2458_v3 }
  0x9e   : > { %v958_v2 = vpop.permute.xlu1 %957  ;;  %2276 = vmatprep.subr.msk.mxu1 %vm412_vm2, %v870_v62  ;;  %v956_v4 = vpop.permute.xlu0 %955 }
  0x9f   : > { %v960_v5 = vsel %vm959_vm7, %v956_v4, %v958_v2  ;;  %v961_v6 = vsel %vm959_vm7, %v958_v2, %v956_v4  ;;  %2277 = vmatpush1.msk.msra.mxu1 %vm412_vm2, %v869_v61 }
  0xa0   : > { %v970_v7 = vmul.f32 %v2711_v60, %v960_v5  ;;  %v971_v9 = vmul.f32 %v2717_v63, %v961_v6  ;;  %2278 = vmatmul.mubr.msk.f32.vlgmr.msra.gmra.mxu1 %vm408_vm4, %v2275_v1  ;;  %v1266_v5 = vld [vmem:[#allocation2] sm:$0xff] }
  0xa1   : > { %1148 = vmatprep.mubr.f32.mxu1 %v2458_v3 }
  0xa2   : > { %v1059_v15 = vpop.permute.xlu1 %1058  ;;  %2280 = vmatprep.subr.msk.mxu0 %vm412_vm2, %v971_v9  ;;  %v1057_v20 = vpop.permute.xlu0 %1056 }
  0xa3   : > { %v1061_v21 = vsel %vm1060_vm8, %v1057_v20, %v1059_v15  ;;  %v1062_v11 = vsel %vm1060_vm8, %v1059_v15, %v1057_v20  ;;  %2281 = vmatpush1.msk.msra.mxu0 %vm412_vm2, %v970_v7 }
  0xa4   : > { %v1071_v12 = vmul.f32 %v2737_v10, %v1061_v21  ;;  %v1072_v24 = vmul.f32 %v2740_v13, %v1062_v11  ;;  %2282 = vmatmul.mubr.msk.f32.vlgmr.msra.gmra.mxu0 %vm408_vm4, %v2279_v14  ;;  %v1267_v14 = vld [vmem:[#allocation2 + $0x8] sm:$0xff]  ;;  %v1268_v11 = vmul.f32 0.9, %v1266_v5 }
  0xa5   : > { %1249 = vmatprep.mubr.f32.mxu0 %v2458_v3 }
  0xa6   : > { %v1160_v28 = vpop.permute.xlu1 %1159  ;;  %2284 = vmatprep.subr.msk.mxu1 %vm412_vm2, %v1072_v24  ;;  %v1158_v29 = vpop.permute.xlu0 %1157 }
  0xa7   : > { %v1162_v30 = vsel %vm1161_vm9, %v1158_v29, %v1160_v28  ;;  %v1163_v31 = vsel %vm1161_vm9, %v1160_v28, %v1158_v29  ;;  %2285 = vmatpush1.msk.msra.mxu1 %vm412_vm2, %v1071_v12 }
  0xa8   : > { %v1172_v32 = vmul.f32 %v2759_v25, %v1162_v30  ;;  %v1173_v33 = vmul.f32 %v2764_v26, %v1163_v31  ;;  %2286 = vmatmul.mubr.msk.f32.vlgmr.msra.gmra.mxu1 %vm408_vm4, %v2283_v27  ;;  %v1269_v27 = vmul.f32 0.9, %v1267_v14  ;;  %v1290_v14 = vld [vmem:[%s2942_s4] sm:$0xff] }
  0xa9   : > { %1369 = vmatprep.mubr.f32.mxu1 %v2458_v3 }
  0xaa   : > { %2290 = vmatprep.subr.msk.mxu0 %vm412_vm2, %v1173_v33 }
  0xab   : > { %2291 = vmatpush1.msk.msra.mxu0 %vm412_vm2, %v1172_v32 }
  0xac   : > { %2292 = vmatmul.mubr.msk.f32.vlgmr.msra.gmra.mxu0 %vm408_vm4, %v2289_v34 }
  0xad   : > { %1443 = vmatprep.mubr.f32.mxu0 %v2458_v3 }
  0xb3   : > { %v1262_v15 = vpop.permute.xlu0 %1261 }
 0x154   : > { %v485_v35 = vpop.f32.mrf.mxu0  ;;  %v565_v36 = vpop.f32.mrf.mxu1 }
 0x155   : > { %v566_v37 = vadd.f32 %v565_v36, %v485_v35 }
 0x156   : > { %v487_v38 = vpop.f32.mrf.mxu0  ;;  %v567_v40 = vpop.f32.mrf.mxu1 }
 0x157   : > { %v568_v41 = vadd.f32 %v567_v40, %v487_v38  ;;  %v2069_v38 = vld [vmem:[%s2945_s7] sm:$0xff] }
 0x158   : > { %v664_v42 = vpop.f32.mrf.mxu0 }
 0x159   : > { %v669_v44 = vadd.f32 %v664_v42, %v566_v37  ;;  %v2044_v37 = vld [vmem:[%s2943_s5] sm:$0xff] }
 0x15a   : > { %v666_v45 = vpop.f32.mrf.mxu0 }
 0x15b   : > { %v670_v46 = vadd.f32 %v666_v45, %v568_v41 }
 0x15c   : > { %v765_v47 = vpop.f32.mrf.mxu1  ;;  %v847_v48 = vpop.f32.mrf.mxu0 }
 0x15d   : > { %v770_v50 = vadd.f32 %v765_v47, %v669_v44 }
 0x15e   : > { %v767_v51 = vpop.f32.mrf.mxu1  ;;  %v849_v55 = vpop.f32.mrf.mxu0 }
 0x15f   : > { %v771_v52 = vadd.f32 %v767_v51, %v670_v46  ;;  %v852_v54 = vadd.f32 %v847_v48, %v770_v50 }
 0x160   : > { %v948_v56 = vpop.f32.mrf.mxu1 }
 0x161   : > { %v853_v57 = vadd.f32 %v849_v55, %v771_v52  ;;  %v953_v58 = vadd.f32 %v948_v56, %v852_v54 }
 0x162   : > { %v950_v59 = vpop.f32.mrf.mxu1 }
 0x163   : > { %v954_v62 = vadd.f32 %v950_v59, %v853_v57  ;;  %v2295_v59 = vld [vmem:[%s2942_s4 + $0x8] sm:$0xff] }
 0x164   : > { %v1049_v61 = vpop.f32.mrf.mxu0 }
 0x165   : > { %v1054_v0 = vadd.f32 %v1049_v61, %v953_v58 }
 0x166   : > { %v1051_v1 = vpop.f32.mrf.mxu0 }
 0x167   : > { %v1055_v6 = vadd.f32 %v1051_v1, %v954_v62 }
 0x168   : > { %v1150_v2 = vpop.f32.mrf.mxu1 }
 0x169   : > { %v1155_v7 = vadd.f32 %v1150_v2, %v1054_v0 }
 0x16a   : > { %v1152_v4 = vpop.f32.mrf.mxu1 }
 0x16b   : > { %v1156_v20 = vadd.f32 %v1152_v4, %v1055_v6 }
 0x16c   : > { %v1251_v9 = vpop.f32.mrf.mxu0 }
 0x16d   : > { %v1256_v21 = vadd.f32 %v1251_v9, %v1155_v7 }
 0x16e   : > { %v1253_v12 = vpop.f32.mrf.mxu0 }
 0x16f   : > { %v1257_v24 = vadd.f32 %v1253_v12, %v1156_v20  ;;  %v1264_v28 = vadd.f32 %v1262_v15, %v1256_v21 }
 0x171   : > { %v1265_v29 = vadd.f32 %v1262_v15, %v1257_v24  ;;  %v2787_v30 = vadd.f32 %v1268_v11, %v1264_v28  ;;  %v2466_v15 = vmov 1.0  }
 0x173   : > { %v2789_v31 = vadd.f32 %v1269_v27, %v1265_v29  ;;  %vm1272_vm10 = vcmp.gt.f32.partialorder %v2787_v30, 1.0 }
 0x174   : > { %v2293_v32 = vsel %vm1272_vm10, 1.0, %v2458_v3 }
 0x175   : > { %vm1273_vm11 = vcmp.gt.f32.partialorder %v2789_v31, 1.0  ;;  %v1278_v33 = vsub.f32 %v2787_v30, %v2293_v32 }
 0x176   : > { %v2294_v34 = vsel %vm1273_vm11, 1.0, %v2458_v3 }
 0x177   : > { %v1279_v35 = vsub.f32 %v2789_v31, %v2294_v34  ;;  %1280 = vst [vmem:[#allocation2] sm:$0xff] %v1278_v33  ;;  %v2384_v36 = vpack.i.bf16 %v2294_v34, %v2293_v32  ;;  %v2300_v32 = vld [vmem:[%s2942_s4 + $0x18] sm:$0xff] }
 0x179   : > { %1281 = vst [vmem:[#allocation2 + $0x8] sm:$0xff] %v1279_v35  ;;  %2385 = vrot.lane.b32.xlu0 %v2384_v36, %s2459_s26  ;;  %2375 = vrot.lane.b32.xlu1 %v2384_v36, %s2457_s25 }
 0x17d   : > { %2395 = vrot.lane.b32.xlu0 %v2384_v36, %s2461_s28  ;;  %2380 = vrot.lane.b32.xlu1 %v2384_v36, %s2456_s24 }
 0x181   : > { %2405 = vrot.lane.b32.xlu0 %v2384_v36, %s2464_s13  ;;  %2390 = vrot.lane.b32.xlu1 %v2384_v36, %s2460_s27 }
 0x185   : > { %2047 = vperm.xlu0 %2373, %v2044_v37   ;;  %2400 = vrot.lane.b32.xlu1 %v2384_v36, %s2462_s12 }
 0x189   : > { %2410 = vrot.lane.b32.xlu1 %v2384_v36, %s2465_s14 }
 0x18d   : > { %2072 = vperm.xlu1 %2414, %v2069_v38  }
 0x1eb   : > { %v2386_v40 = vpop.permute.xlu0 %2385  ;;  %v2376_v41 = vpop.permute.xlu1 %2375 }
 0x1ec   : > { %v2388_v42 = vunpack.i.h.bf16 %v2386_v40  ;;  %v2387_v44 = vunpack.i.l.bf16 %v2386_v40  ;;  %v2378_v45 = vunpack.i.h.bf16 %v2376_v41  ;;  %v2377_v46 = vunpack.i.l.bf16 %v2376_v41 }
 0x1ee   : > { %v1455_v47 = vsel %vm574_vm3, %v2388_v42, %v2387_v44  ;;  %v1296_v48 = vsel %vm393_vm1, %v2378_v45, %v2377_v46  ;;  %v1295_v50 = vsel %vm393_vm1, %v2377_v46, %v2378_v45  ;;  %v1454_v51 = vsel %vm574_vm3, %v2387_v44, %v2388_v42  ;;  %v2306_v44 = vld [vmem:[%s2942_s4 + $0x28] sm:$0xff] }
 0x1ef   : > { %v1297_v52 = vmul.f32 %v1296_v48, %v2616_v17  ;;  %v2396_v54 = vpop.permute.xlu0 %2395  ;;  %v2381_v55 = vpop.permute.xlu1 %2380  ;;  %v1298_v56 = vmul.f32 %v1295_v50, %v2622_v19  ;;  %v1456_v61 = vmul.f32 %v1455_v47, %v2626_v22  ;;  %v1457_v62 = vmul.f32 %v1454_v51, %v2629_v23 }
 0x1f0   : > { %v2383_v57 = vunpack.i.h.bf16 %v2381_v55  ;;  %v2382_v58 = vunpack.i.l.bf16 %v2381_v55  ;;  %v2398_v0 = vunpack.i.h.bf16 %v2396_v54  ;;  %v2397_v1 = vunpack.i.l.bf16 %v2396_v54 }
 0x1f1   : > { %1335 = vmatprep.subr.mxu1 %v1298_v56 }
 0x1f2   : > { %v1287_v17 = vsel %vm375_vm0, %v2383_v57, %v2382_v58  ;;  %1336 = vmatpush1.msra.mxu1 %v1297_v52  ;;  %v1286_v19 = vsel %vm375_vm0, %v2382_v58, %v2383_v57  ;;  %v1705_v21 = vsel %vm858_vm6, %v2398_v0, %v2397_v1  ;;  %v1704_v11 = vsel %vm858_vm6, %v2397_v1, %v2398_v0 }
 0x1f3   : > { %v1288_v2 = vmul.f32 %v1287_v17, %v2613_v16  ;;  %v2406_v4 = vpop.permute.xlu0 %2405  ;;  %v2391_v5 = vpop.permute.xlu1 %2390  ;;  %2296 = vmatmul.mubr.msk.f32.vlgmr.msra.gmra.mxu1 %vm1301_vm12, %v2295_v59  ;;  %1493 = vmatprep.subr.mxu1 %v1457_v62  ;;  %v1289_v22 = vmul.f32 %v1286_v19, %v2619_v18  ;;  %v2298_v16 = vld [vmem:[%s2942_s4 + $0x10] sm:$0xff]  ;;  %v1707_v33 = vmul.f32 %v1705_v21, %v2689_v53 }
 0x1f4   : > { %v2408_v6 = vunpack.i.h.bf16 %v2406_v4  ;;  %v2407_v23 = vunpack.i.l.bf16 %v2406_v4  ;;  %v2393_v7 = vunpack.i.h.bf16 %v2391_v5  ;;  %v2392_v9 = vunpack.i.l.bf16 %v2391_v5  ;;  %1494 = vmatpush1.msra.mxu1 %v1456_v61  ;;  %1527 = vmatprep.mubr.f32.mxu1 %v2458_v3 }
 0x1f5   : > { %1409 = vmatprep.subr.mxu0 %v1289_v22  ;;  %2303 = vmatprep.subr.msk.mxu1 %vm1273_vm11, %v2466_v15  ;;  %v1706_v34 = vmul.f32 %v1704_v11, %v2682_v49 }
 0x1f6   : > { %v1541_v18 = vsel %vm675_vm5, %v2393_v7, %v2392_v9  ;;  %1410 = vmatpush1.msra.mxu0 %v1288_v2  ;;  %v1540_v20 = vsel %vm675_vm5, %v2392_v9, %v2393_v7  ;;  %v1876_v35 = vsel %vm1060_vm8, %v2407_v23, %v2408_v6  ;;  %v2052_v9 = vld [vmem:[#allocation3 + $0x8] sm:$0xff] }
 0x1f7   : > { %v1542_v12 = vmul.f32 %v1541_v18, %v2659_v39  ;;  %v2401_v24 = vpop.permute.xlu1 %2400  ;;  %2297 = vmatmul.mubr.msk.f32.vlgmr.msra.gmra.mxu0 %vm1301_vm12, %v1290_v14  ;;  %2299 = vmatmul.mubr.msk.f32.vlgmr.msra.gmra.mxu1 %vm1301_vm12, %v2298_v16  ;;  %v1543_v27 = vmul.f32 %v1540_v20, %v2666_v43  ;;  %v1877_v39 = vsel %vm1060_vm8, %v2408_v6, %v2407_v23  ;;  %v2302_v43 = vld [vmem:[%s2942_s4 + $0x20] sm:$0xff]  ;;  %v2053_v20 = vld [vmem:[#allocation3] sm:$0xff] }
 0x1f8   : > { %v2403_v28 = vunpack.i.h.bf16 %v2401_v24  ;;  %v2402_v29 = vunpack.i.l.bf16 %v2401_v24  ;;  %2304 = vmatpush1.msk.msra.mxu1 %vm1272_vm10, %v2466_v15  ;;  %1613 = vmatprep.mubr.f32.mxu0 %v2458_v3  ;;  %v1879_v49 = vmul.f32 %v1877_v39, %v2740_v13  ;;  %v1878_v45 = vmul.f32 %v1876_v35, %v2737_v10  ;;  %v2310_v10 = vld [vmem:[%s2942_s4 + $0x38] sm:$0xff] }
 0x1f9   : > { %1579 = vmatprep.subr.mxu0 %v1543_v27  ;;  %1691 = vmatprep.mubr.f32.mxu1 %v2458_v3  ;;  %v2054_v24 = vmul.f32 0.9, %v2052_v9 }
 0x1fa   : > { %v1790_v36 = vsel %vm959_vm7, %v2402_v29, %v2403_v28  ;;  %1580 = vmatpush1.msra.mxu0 %v1542_v12  ;;  %v1791_v37 = vsel %vm959_vm7, %v2403_v28, %v2402_v29 }
 0x1fb   : > { %v1792_v53 = vmul.f32 %v1790_v36, %v2711_v60  ;;  %v2411_v38 = vpop.permute.xlu1 %2410  ;;  %2301 = vmatmul.mubr.msk.f32.vlgmr.msra.gmra.mxu0 %vm1301_vm12, %v2300_v32  ;;  %1743 = vmatprep.subr.mxu0 %v1707_v33  ;;  %v1793_v40 = vmul.f32 %v1791_v37, %v2717_v63  ;;  %v2308_v60 = vld [vmem:[%s2942_s4 + $0x30] sm:$0xff]  ;;  %v2055_v33 = vmul.f32 0.9, %v2053_v20 }
 0x1fc   : > { %v2413_v41 = vunpack.i.h.bf16 %v2411_v38  ;;  %v2412_v42 = vunpack.i.l.bf16 %v2411_v38  ;;  %1744 = vmatpush1.msra.mxu0 %v1706_v34  ;;  %2305 = vmatmul.mubr.msk.f32.vlgmr.msra.gmra.mxu1 %vm1301_vm12, %v2302_v43 }
 0x1fd   : > { %1829 = vmatprep.subr.mxu1 %v1793_v40  ;;  %1915 = vmatprep.subr.mxu0 %v1879_v49 }
 0x1fe   : > { %v1962_v63 = vsel %vm1161_vm9, %v2412_v42, %v2413_v41  ;;  %1777 = vmatprep.mubr.f32.mxu0 %v2458_v3  ;;  %1830 = vmatpush1.msra.mxu1 %v1792_v53  ;;  %v1963_v13 = vsel %vm1161_vm9, %v2413_v41, %v2412_v42 }
 0x1ff   : > { %v1964_v46 = vmul.f32 %v2759_v25, %v1962_v63  ;;  %2307 = vmatmul.mubr.msk.f32.vlgmr.msra.gmra.mxu0 %vm1301_vm12, %v2306_v44  ;;  %1863 = vmatprep.mubr.f32.mxu1 %v2458_v3  ;;  %v1965_v47 = vmul.f32 %v2764_v26, %v1963_v13  ;;  %v2068_v25 = vld [vmem:[%s2944_s6] sm:$0xff] }
 0x200   : > { %1916 = vmatpush1.msra.mxu0 %v1878_v45  ;;  %2309 = vmatmul.mubr.msk.f32.vlgmr.msra.gmra.mxu1 %vm1301_vm12, %v2308_v60  ;;  %v2048_v21 = vpop.permute.xlu0 %2047 }
 0x201   : > { %2316 = vmatprep.subr.msk.mxu0 %vm1273_vm11, %v2466_v15  ;;  %2001 = vmatprep.subr.mxu1 %v1965_v47 }
 0x202   : > { %1949 = vmatprep.mubr.f32.mxu0 %v2458_v3  ;;  %2002 = vmatpush1.msra.mxu1 %v1964_v46 }
 0x203   : > { %2311 = vmatmul.mubr.msk.f32.vlgmr.msra.gmra.mxu0 %vm1301_vm12, %v2310_v10  ;;  %2035 = vmatprep.mubr.f32.mxu1 %v2458_v3 }
 0x204   : > { %2317 = vmatpush1.msk.msra.mxu0 %vm1272_vm10, %v2466_v15  ;;  %2313 = vmatmul.mubr.msk.f32.vlgmr.msra.gmra.mxu1 %vm1301_vm12, %v2312_v8 }
 0x205   : > { %2142 = vmatprep.mubr.f32.mxu0 %v2458_v3 }
 0x207   : > { %2318 = vmatmul.mubr.msk.f32.vlgmr.msra.gmra.mxu0 %vm1301_vm12, %v2068_v25 }
 0x208   : > { %v2073_v27 = vpop.permute.xlu1 %2072 }
 0x2b3   : > { %v1371_v26 = vpop.f32.mrf.mxu1 }
 0x2b5   : > { %v1373_v31 = vpop.f32.mrf.mxu1 }
 0x2b7   : > { %v1445_v48 = vpop.f32.mrf.mxu0  ;;  %v1529_v50 = vpop.f32.mrf.mxu1 }
 0x2b8   : > { %v1446_v51 = vadd.f32 %v1445_v48, %v1371_v26 }
 0x2b9   : > { %v1447_v52 = vpop.f32.mrf.mxu0  ;;  %v1531_v54 = vpop.f32.mrf.mxu1 }
 0x2ba   : > { %v1448_v55 = vadd.f32 %v1447_v52, %v1373_v31  ;;  %v1534_v30 = vadd.f32 %v1529_v50, %v1446_v51 }
 0x2bb   : > { %v1615_v56 = vpop.f32.mrf.mxu0 }
 0x2bc   : > { %v1535_v57 = vadd.f32 %v1531_v54, %v1448_v55  ;;  %v1620_v58 = vadd.f32 %v1615_v56, %v1534_v30  ;;  %v1693_v59 = vpop.f32.mrf.mxu1 }
 0x2bd   : > { %v1617_v61 = vpop.f32.mrf.mxu0 }
 0x2be   : > { %v1621_v62 = vadd.f32 %v1617_v61, %v1535_v57  ;;  %v1698_v0 = vadd.f32 %v1693_v59, %v1620_v58  ;;  %v1695_v1 = vpop.f32.mrf.mxu1 }
 0x2bf   : > { %v1779_v17 = vpop.f32.mrf.mxu0 }
 0x2c0   : > { %v1699_v19 = vadd.f32 %v1695_v1, %v1621_v62  ;;  %v1784_v2 = vadd.f32 %v1779_v17, %v1698_v0  ;;  %v1865_v4 = vpop.f32.mrf.mxu1 }
 0x2c1   : > { %v1781_v5 = vpop.f32.mrf.mxu0 }
 0x2c2   : > { %v1785_v22 = vadd.f32 %v1781_v5, %v1699_v19  ;;  %v1870_v6 = vadd.f32 %v1865_v4, %v1784_v2  ;;  %v1867_v23 = vpop.f32.mrf.mxu1 }
 0x2c3   : > { %v1951_v7 = vpop.f32.mrf.mxu0 }
 0x2c4   : > { %v1871_v14 = vadd.f32 %v1867_v23, %v1785_v22  ;;  %v1956_v16 = vadd.f32 %v1951_v7, %v1870_v6  ;;  %v2037_v15 = vpop.f32.mrf.mxu1 }
 0x2c5   : > { %v1953_v18 = vpop.f32.mrf.mxu0 }
 0x2c6   : > { %v1957_v11 = vadd.f32 %v1953_v18, %v1871_v14  ;;  %v2042_v12 = vadd.f32 %v2037_v15, %v1956_v16  ;;  %v2039_v28 = vpop.f32.mrf.mxu1 }
 0x2c7   : > { %v2144_v29 = vpop.f32.mrf.mxu0 }
 0x2c8   : > { %v2050_v32 = vadd.f32 %v2048_v21, %v2042_v12  ;;  %v2043_v39 = vadd.f32 %v2039_v28, %v1957_v11  ;;  %v2145_v35 = vadd.f32 %v2144_v29, %v2073_v27 }
 0x2c9   : > { %v2146_v36 = vpop.f32.mrf.mxu0 }
 0x2ca   : > { %v2056_v43 = vadd.f32 %v2054_v24, %v2050_v32  ;;  %v2051_v34 = vadd.f32 %v2048_v21, %v2043_v39  ;;  %v2147_v49 = vadd.f32 %v2146_v36, %v2073_v27 }
 0x2cc   : > { %v2057_v37 = vadd.f32 %v2055_v33, %v2051_v34  ;;  %vm2058_vm13 = vcmp.gt.f32.partialorder %v2056_v43, 1.0 }
 0x2cd   : > { %v2314_v53 = vsel %vm2058_vm13, 1.0, %v2458_v3 }
 0x2ce   : > { %v2064_v38 = vsub.f32 %v2056_v43, %v2314_v53  ;;  %v2149_v40 = vadd.f32 %v2314_v53, %v2145_v35  ;;  %vm2059_vm14 = vcmp.gt.f32.partialorder %v2057_v37, 1.0 }
 0x2cf   : > { %v2315_v41 = vsel %vm2059_vm14, 1.0, %v2458_v3 }
 0x2d0   : > { %2066 = vst [vmem:[#allocation3 + $0x8] sm:$0xff] %v2064_v38  ;;  %2151 = vst [vmem:[%s2548_s23] sm:$0xff] %v2149_v40  ;;  %v2065_v42 = vsub.f32 %v2057_v37, %v2315_v41  ;;  %v2150_v44 = vadd.f32 %v2315_v41, %v2147_v49 }
 0x2d2   : > { %2067 = vst [vmem:[#allocation3] sm:$0xff] %v2065_v42  ;;  %2152 = vst [vmem:[%s2548_s23 + $0x8] sm:$0xff] %v2150_v44 }
 0x2d3 PF: > { %s18_s9 = sadd.s32 1, %s2453_s9   ;;  %s2947_s27 = smov %s2445_s29 }
 0x2d4   : > { %p15_p8 = scmp.ge.s32.totalorder %s18_s9, 10   ;;  %s2948_s28 = smov %s2449_s30 }
 0x2d5   : > { %s2949_s29 = smov %s2952_s10  ;;  %s2950_s30 = smov %s2956_s11 }
 0x2d6   :  { %17 = sbr.rel (!%p15_p8) target bundleno = 3 (0x3), region = 102 }

</bundles_post_ra>
